<compile_context>
chip_gen: v6e
topology: v6e:2x2x1
jax: 0.10.0
libtpu: 0.0.40
codegen_flags: <defaults>
</compile_context>

<pallas_src>
import math

import jax
import jax.numpy as jnp
from jax.experimental import pallas as pl
from jax.experimental.pallas import tpu as pltpu

INPUT_SIZE = 64
HIDDEN = 104
PAD = 128  # lane-aligned hidden width used inside the kernel


def _odefunc_ex_kernel(
    y_ref,
    w1_ref, b1_ref,
    w2_ref, b2_ref,
    w3_ref, b3_ref,
    w4_ref, b4_ref,
    w5_ref, b5_ref,
    out_ref,
):
    # Fused 5-layer MLP, all operands VMEM-resident. w5/b5 arrive pre-negated
    # so the final store already holds -F(y); padded hidden lanes stay zero
    # through bias+ReLU because their weight columns / bias lanes are zero.
    x = y_ref[...]

    h = jnp.dot(x, w1_ref[...], preferred_element_type=jnp.float32) + b1_ref[...]
    h = jnp.maximum(h, 0.0)

    h = jnp.dot(h, w2_ref[...], preferred_element_type=jnp.float32) + b2_ref[...]
    h = jnp.maximum(h, 0.0)

    h = jnp.dot(h, w3_ref[...], preferred_element_type=jnp.float32) + b3_ref[...]
    h = jnp.maximum(h, 0.0)

    h = jnp.dot(h, w4_ref[...], preferred_element_type=jnp.float32) + b4_ref[...]
    h = jnp.maximum(h, 0.0)

    h = jnp.dot(h, w5_ref[...], preferred_element_type=jnp.float32) + b5_ref[...]

    out_ref[...] = h.astype(out_ref.dtype)


def prepare_params(params):
    """Pad logical (104-wide) params to 128 lanes on the hidden dim and fold
    the -F negation into the last layer. Padded rows/cols/bias lanes are zero,
    so padded hidden lanes stay exactly 0 through bias+ReLU. The last layer
    keeps its true 64-wide output."""

    def pad_w(w, rows, cols):
        out = jnp.zeros((rows, cols), dtype=jnp.float32)
        return out.at[: w.shape[0], : w.shape[1]].set(w)

    def pad_b(b, cols):
        out = jnp.zeros((1, cols), dtype=jnp.float32)
        return out.at[:, : b.shape[1]].set(b)

    prepped = {
        "w1": pad_w(params["w1"], INPUT_SIZE, PAD),
        "b1": pad_b(params["b1"], PAD),
        "w2": pad_w(params["w2"], PAD, PAD),
        "b2": pad_b(params["b2"], PAD),
        "w3": pad_w(params["w3"], PAD, PAD),
        "b3": pad_b(params["b3"], PAD),
        "w4": pad_w(params["w4"], PAD, PAD),
        "b4": pad_b(params["b4"], PAD),
        # negation of the whole network folded into the last layer
        "w5": pad_w(-params["w5"], PAD, INPUT_SIZE),
        "b5": pad_b(-params["b5"], INPUT_SIZE),
    }
    return prepped


def odefunc_ex_forward(y, prepped_params, *, batch_tile=None):
    """Compute -F(y) with a single fused Pallas kernel.

    y:              (B, INPUT_SIZE) float32
    prepped_params: output of prepare_params (128-lane padded hidden,
                    w5/b5 negated)
    """
    B, D = y.shape
    assert D == INPUT_SIZE
    if batch_tile is None:
        # 256 rows fills the MXU sublane dimension and gives a multi-step
        # parallel grid (megacore sharding) when B is large; fall back to B
        # for the small batches typical of an ODE solver step.
        batch_tile = 256 if (B >= 256 and B % 256 == 0) else B
    assert B % batch_tile == 0

    full = lambda shape: pl.BlockSpec(shape, lambda i: (0, 0))
    y_spec = pl.BlockSpec((batch_tile, INPUT_SIZE), lambda i: (i, 0))
    out_spec = pl.BlockSpec((batch_tile, INPUT_SIZE), lambda i: (i, 0))

    weight_args = [
        prepped_params["w1"], prepped_params["b1"],
        prepped_params["w2"], prepped_params["b2"],
        prepped_params["w3"], prepped_params["b3"],
        prepped_params["w4"], prepped_params["b4"],
        prepped_params["w5"], prepped_params["b5"],
    ]
    weight_specs = [full(p.shape) for p in weight_args]

    out = pl.pallas_call(
        _odefunc_ex_kernel,
        out_shape=jax.ShapeDtypeStruct((B, INPUT_SIZE), jnp.float32),
        grid_spec=pltpu.PrefetchScalarGridSpec(
            num_scalar_prefetch=0,
            grid=(B // batch_tile,),
            in_specs=[y_spec] + weight_specs,
            out_specs=out_spec,
        ),
        compiler_params=pltpu.CompilerParams(
            dimension_semantics=("parallel",),
        ),
    )(y, *weight_args)

    return out


def init_params(key):
    """Logical (unpadded) params mirroring the PyTorch module:
    weights ~ N(0, 0.01); biases ~ U(-1/sqrt(fan_in), 1/sqrt(fan_in))
    (nn.Linear default bias init). Weights stored transposed (in, out)."""
    dims = [
        (INPUT_SIZE, HIDDEN),
        (HIDDEN, HIDDEN),
        (HIDDEN, HIDDEN),
        (HIDDEN, HIDDEN),
        (HIDDEN, INPUT_SIZE),
    ]
    params = {}
    for idx, (fan_in, fan_out) in enumerate(dims, start=1):
        key, kw, kb = jax.random.split(key, 3)
        w = 0.01 * jax.random.normal(kw, (fan_in, fan_out), dtype=jnp.float32)
        bound = 1.0 / math.sqrt(fan_in)
        b = jax.random.uniform(
            kb, (1, fan_out), minval=-bound, maxval=bound, dtype=jnp.float32
        )
        params[f"w{idx}"] = w
        params[f"b{idx}"] = b
    return params


def reference_forward(y, params):
    h = y
    for i in range(1, 5):
        h = jnp.maximum(h @ params[f"w{i}"] + params[f"b{i}"], 0.0)
    h = h @ params["w5"] + params["b5"]
    return -h


if __name__ == "__main__":
    key = jax.random.PRNGKey(0)
    kp, ky, ky2 = jax.random.split(key, 3)
    params = init_params(kp)
    prepped = prepare_params(params)

    t = jnp.float32(0.0)  # t is unused in the forward pass, kept for parity
    # TODO(synk): self.nfe counter is Python-side bookkeeping, not translated.

    # Small-batch case (typical ODE-solver call), grid = 1.
    B = 8
    y = jax.random.normal(ky, (B, INPUT_SIZE), dtype=jnp.float32)
    out = jax.block_until_ready(odefunc_ex_forward(y, prepped))
    ref = reference_forward(y, params)
    assert out.shape == (B, INPUT_SIZE)
    assert jnp.allclose(out, ref, atol=1e-5, rtol=1e-5)

    # Larger batch exercising the multi-step parallel grid (batch_tile=256).
    B2 = 512
    y2 = jax.random.normal(ky2, (B2, INPUT_SIZE), dtype=jnp.float32)
    out2 = jax.block_until_ready(odefunc_ex_forward(y2, prepped))
    ref2 = reference_forward(y2, params)
    assert out2.shape == (B2, INPUT_SIZE)
    assert jnp.allclose(out2, ref2, atol=1e-5, rtol=1e-5)

    print("KERNEL_OK")
</pallas_src>

<mosaic_0001>
module attributes {stable_mosaic.version = 11 : i64} {
  func.func @_odefunc_ex_kernel(%arg0: i32, %arg1: memref<8x64xf32, #tpu.memory_space<vmem>>, %arg2: memref<64x128xf32, #tpu.memory_space<vmem>>, %arg3: memref<1x128xf32, #tpu.memory_space<vmem>>, %arg4: memref<128x128xf32, #tpu.memory_space<vmem>>, %arg5: memref<1x128xf32, #tpu.memory_space<vmem>>, %arg6: memref<128x128xf32, #tpu.memory_space<vmem>>, %arg7: memref<1x128xf32, #tpu.memory_space<vmem>>, %arg8: memref<128x128xf32, #tpu.memory_space<vmem>>, %arg9: memref<1x128xf32, #tpu.memory_space<vmem>>, %arg10: memref<128x64xf32, #tpu.memory_space<vmem>>, %arg11: memref<1x64xf32, #tpu.memory_space<vmem>>, %arg12: memref<8x64xf32, #tpu.memory_space<vmem>>) attributes {dimension_semantics = [#tpu.dimension_semantics<parallel>], iteration_bounds = array<i64: 1>, scalar_prefetch = 0 : i64, scratch_operands = 0 : i64, tpu.core_type = #tpu.core_type<tc>, window_params = [{transform_indices = @transform_0, window_bounds = array<i64: 8, 64>}, {pipeline_mode = #tpu.pipeline_mode<synchronous>, transform_indices = @transform_1, window_bounds = array<i64: 64, 128>}, {pipeline_mode = #tpu.pipeline_mode<synchronous>, transform_indices = @transform_2, window_bounds = array<i64: 1, 128>}, {pipeline_mode = #tpu.pipeline_mode<synchronous>, transform_indices = @transform_3, window_bounds = array<i64: 128, 128>}, {pipeline_mode = #tpu.pipeline_mode<synchronous>, transform_indices = @transform_4, window_bounds = array<i64: 1, 128>}, {pipeline_mode = #tpu.pipeline_mode<synchronous>, transform_indices = @transform_5, window_bounds = array<i64: 128, 128>}, {pipeline_mode = #tpu.pipeline_mode<synchronous>, transform_indices = @transform_6, window_bounds = array<i64: 1, 128>}, {pipeline_mode = #tpu.pipeline_mode<synchronous>, transform_indices = @transform_7, window_bounds = array<i64: 128, 128>}, {pipeline_mode = #tpu.pipeline_mode<synchronous>, transform_indices = @transform_8, window_bounds = array<i64: 1, 128>}, {pipeline_mode = #tpu.pipeline_mode<synchronous>, transform_indices = @transform_9, window_bounds = array<i64: 128, 64>}, {pipeline_mode = #tpu.pipeline_mode<synchronous>, transform_indices = @transform_10, window_bounds = array<i64: 1, 64>}, {transform_indices = @transform_11, window_bounds = array<i64: 8, 64>}]} {
    %c0 = arith.constant 0 : index
    %c0_0 = arith.constant 0 : index
    %0 = vector.load %arg1[%c0, %c0_0] : memref<8x64xf32, #tpu.memory_space<vmem>>, vector<8x64xf32>
    %c0_1 = arith.constant 0 : index
    %c0_2 = arith.constant 0 : index
    %1 = vector.load %arg2[%c0_1, %c0_2] : memref<64x128xf32, #tpu.memory_space<vmem>>, vector<64x128xf32>
    %cst = arith.constant dense<0.000000e+00> : vector<8x128xf32>
    %2 = tpu.matmul %0, %1, %cst {dimension_numbers = #tpu.dot_dimension_numbers<[1], [0], [0], [1], [0, 0, 1, 1], [], []>} : vector<8x64xf32>, vector<64x128xf32>, vector<8x128xf32> -> vector<8x128xf32>
    %c0_3 = arith.constant 0 : index
    %c0_4 = arith.constant 0 : index
    %3 = vector.load %arg3[%c0_3, %c0_4] : memref<1x128xf32, #tpu.memory_space<vmem>>, vector<1x128xf32>
    %4 = vector.broadcast %3 : vector<1x128xf32> to vector<8x128xf32>
    %5 = arith.addf %2, %4 : vector<8x128xf32>
    %cst_5 = arith.constant 0.000000e+00 : f32
    %6 = vector.broadcast %cst_5 : f32 to vector<8x128xf32>
    %7 = arith.maximumf %5, %6 : vector<8x128xf32>
    %c0_6 = arith.constant 0 : index
    %c0_7 = arith.constant 0 : index
    %8 = vector.load %arg4[%c0_6, %c0_7] : memref<128x128xf32, #tpu.memory_space<vmem>>, vector<128x128xf32>
    %cst_8 = arith.constant dense<0.000000e+00> : vector<8x128xf32>
    %9 = tpu.matmul %7, %8, %cst_8 {dimension_numbers = #tpu.dot_dimension_numbers<[1], [0], [0], [1], [0, 0, 1, 1], [], []>} : vector<8x128xf32>, vector<128x128xf32>, vector<8x128xf32> -> vector<8x128xf32>
    %c0_9 = arith.constant 0 : index
    %c0_10 = arith.constant 0 : index
    %10 = vector.load %arg5[%c0_9, %c0_10] : memref<1x128xf32, #tpu.memory_space<vmem>>, vector<1x128xf32>
    %11 = vector.broadcast %10 : vector<1x128xf32> to vector<8x128xf32>
    %12 = arith.addf %9, %11 : vector<8x128xf32>
    %cst_11 = arith.constant 0.000000e+00 : f32
    %13 = vector.broadcast %cst_11 : f32 to vector<8x128xf32>
    %14 = arith.maximumf %12, %13 : vector<8x128xf32>
    %c0_12 = arith.constant 0 : index
    %c0_13 = arith.constant 0 : index
    %15 = vector.load %arg6[%c0_12, %c0_13] : memref<128x128xf32, #tpu.memory_space<vmem>>, vector<128x128xf32>
    %cst_14 = arith.constant dense<0.000000e+00> : vector<8x128xf32>
    %16 = tpu.matmul %14, %15, %cst_14 {dimension_numbers = #tpu.dot_dimension_numbers<[1], [0], [0], [1], [0, 0, 1, 1], [], []>} : vector<8x128xf32>, vector<128x128xf32>, vector<8x128xf32> -> vector<8x128xf32>
    %c0_15 = arith.constant 0 : index
    %c0_16 = arith.constant 0 : index
    %17 = vector.load %arg7[%c0_15, %c0_16] : memref<1x128xf32, #tpu.memory_space<vmem>>, vector<1x128xf32>
    %18 = vector.broadcast %17 : vector<1x128xf32> to vector<8x128xf32>
    %19 = arith.addf %16, %18 : vector<8x128xf32>
    %cst_17 = arith.constant 0.000000e+00 : f32
    %20 = vector.broadcast %cst_17 : f32 to vector<8x128xf32>
    %21 = arith.maximumf %19, %20 : vector<8x128xf32>
    %c0_18 = arith.constant 0 : index
    %c0_19 = arith.constant 0 : index
    %22 = vector.load %arg8[%c0_18, %c0_19] : memref<128x128xf32, #tpu.memory_space<vmem>>, vector<128x128xf32>
    %cst_20 = arith.constant dense<0.000000e+00> : vector<8x128xf32>
    %23 = tpu.matmul %21, %22, %cst_20 {dimension_numbers = #tpu.dot_dimension_numbers<[1], [0], [0], [1], [0, 0, 1, 1], [], []>} : vector<8x128xf32>, vector<128x128xf32>, vector<8x128xf32> -> vector<8x128xf32>
    %c0_21 = arith.constant 0 : index
    %c0_22 = arith.constant 0 : index
    %24 = vector.load %arg9[%c0_21, %c0_22] : memref<1x128xf32, #tpu.memory_space<vmem>>, vector<1x128xf32>
    %25 = vector.broadcast %24 : vector<1x128xf32> to vector<8x128xf32>
    %26 = arith.addf %23, %25 : vector<8x128xf32>
    %cst_23 = arith.constant 0.000000e+00 : f32
    %27 = vector.broadcast %cst_23 : f32 to vector<8x128xf32>
    %28 = arith.maximumf %26, %27 : vector<8x128xf32>
    %c0_24 = arith.constant 0 : index
    %c0_25 = arith.constant 0 : index
    %29 = vector.load %arg10[%c0_24, %c0_25] : memref<128x64xf32, #tpu.memory_space<vmem>>, vector<128x64xf32>
    %cst_26 = arith.constant dense<0.000000e+00> : vector<8x64xf32>
    %30 = tpu.matmul %28, %29, %cst_26 {dimension_numbers = #tpu.dot_dimension_numbers<[1], [0], [0], [1], [0, 0, 1, 1], [], []>} : vector<8x128xf32>, vector<128x64xf32>, vector<8x64xf32> -> vector<8x64xf32>
    %c0_27 = arith.constant 0 : index
    %c0_28 = arith.constant 0 : index
    %31 = vector.load %arg11[%c0_27, %c0_28] : memref<1x64xf32, #tpu.memory_space<vmem>>, vector<1x64xf32>
    %32 = vector.broadcast %31 : vector<1x64xf32> to vector<8x64xf32>
    %33 = arith.addf %30, %32 : vector<8x64xf32>
    %c0_29 = arith.constant 0 : index
    %c0_30 = arith.constant 0 : index
    %34 = vector.load %arg12[%c0_29, %c0_30] : memref<8x64xf32, #tpu.memory_space<vmem>>, vector<8x64xf32>
    tpu.vector_store %arg12[%c0_29, %c0_30], %33 {strides = array<i32>} : memref<8x64xf32, #tpu.memory_space<vmem>>, vector<8x64xf32>,
    return
  }
  func.func @transform_0(%arg0: i32) -> (i32, i32) {
    %c0_i32 = arith.constant 0 : i32
    %c0_i32_0 = arith.constant 0 : i32
    return %arg0, %c0_i32 : i32, i32
  }
  func.func @transform_1(%arg0: i32) -> (i32, i32) {
    %c0_i32 = arith.constant 0 : i32
    %c0_i32_0 = arith.constant 0 : i32
    %c0_i32_1 = arith.constant 0 : i32
    return %c0_i32, %c0_i32_0 : i32, i32
  }
  func.func @transform_2(%arg0: i32) -> (i32, i32) {
    %c0_i32 = arith.constant 0 : i32
    %c0_i32_0 = arith.constant 0 : i32
    %c0_i32_1 = arith.constant 0 : i32
    return %c0_i32, %c0_i32_0 : i32, i32
  }
  func.func @transform_3(%arg0: i32) -> (i32, i32) {
    %c0_i32 = arith.constant 0 : i32
    %c0_i32_0 = arith.constant 0 : i32
    %c0_i32_1 = arith.constant 0 : i32
    return %c0_i32, %c0_i32_0 : i32, i32
  }
  func.func @transform_4(%arg0: i32) -> (i32, i32) {
    %c0_i32 = arith.constant 0 : i32
    %c0_i32_0 = arith.constant 0 : i32
    %c0_i32_1 = arith.constant 0 : i32
    return %c0_i32, %c0_i32_0 : i32, i32
  }
  func.func @transform_5(%arg0: i32) -> (i32, i32) {
    %c0_i32 = arith.constant 0 : i32
    %c0_i32_0 = arith.constant 0 : i32
    %c0_i32_1 = arith.constant 0 : i32
    return %c0_i32, %c0_i32_0 : i32, i32
  }
  func.func @transform_6(%arg0: i32) -> (i32, i32) {
    %c0_i32 = arith.constant 0 : i32
    %c0_i32_0 = arith.constant 0 : i32
    %c0_i32_1 = arith.constant 0 : i32
    return %c0_i32, %c0_i32_0 : i32, i32
  }
  func.func @transform_7(%arg0: i32) -> (i32, i32) {
    %c0_i32 = arith.constant 0 : i32
    %c0_i32_0 = arith.constant 0 : i32
    %c0_i32_1 = arith.constant 0 : i32
    return %c0_i32, %c0_i32_0 : i32, i32
  }
  func.func @transform_8(%arg0: i32) -> (i32, i32) {
    %c0_i32 = arith.constant 0 : i32
    %c0_i32_0 = arith.constant 0 : i32
    %c0_i32_1 = arith.constant 0 : i32
    return %c0_i32, %c0_i32_0 : i32, i32
  }
  func.func @transform_9(%arg0: i32) -> (i32, i32) {
    %c0_i32 = arith.constant 0 : i32
    %c0_i32_0 = arith.constant 0 : i32
    %c0_i32_1 = arith.constant 0 : i32
    return %c0_i32, %c0_i32_0 : i32, i32
  }
  func.func @transform_10(%arg0: i32) -> (i32, i32) {
    %c0_i32 = arith.constant 0 : i32
    %c0_i32_0 = arith.constant 0 : i32
    %c0_i32_1 = arith.constant 0 : i32
    return %c0_i32, %c0_i32_0 : i32, i32
  }
  func.func @transform_11(%arg0: i32) -> (i32, i32) {
    %c0_i32 = arith.constant 0 : i32
    %c0_i32_0 = arith.constant 0 : i32
    return %arg0, %c0_i32 : i32, i32
  }
}

</mosaic_0001>

<bundles_post_ra>
// kernel: tpu_custom_call.1
= control target key start
LH: loop header
LB: loop body
LE: loop exit
PB: predicated region body
PF: predicated region fallthrough
CT: control target
= control target key end

     0   :  { %16 = vsyncpa [#allocation3], 0  ;;  %s1196_s0 = inlined_call_operand.hbm [shape: f32[8,64], index: 0, kind: input, shape index: {}]   ;;  %s1197_s1 = inlined_call_operand.vmem [shape: f32[64,128], index: 1, kind: input, shape index: {}]   ;;  %s1198_s2 = inlined_call_operand.vmem [shape: f32[1,128], index: 2, kind: input, shape index: {}]   ;;  %s1199_s3 = inlined_call_operand.vmem [shape: f32[128,128], index: 3, kind: input, shape index: {}]   ;;  %s1200_s4 = inlined_call_operand.vmem [shape: f32[1,128], index: 4, kind: input, shape index: {}]   ;;  %s1201_s5 = inlined_call_operand.hbm [shape: f32[128,128], index: 5, kind: input, shape index: {}]   ;;  %s1202_s6 = inlined_call_operand.vmem [shape: f32[1,128], index: 6, kind: input, shape index: {}]   ;;  %s1203_s7 = inlined_call_operand.hbm [shape: f32[128,128], index: 7, kind: input, shape index: {}]   ;;  %s1204_s8 = inlined_call_operand.vmem [shape: f32[1,128], index: 8, kind: input, shape index: {}]   ;;  %s1205_s9 = inlined_call_operand.vmem [shape: f32[128,64], index: 9, kind: input, shape index: {}]   ;;  %s1206_s10 = inlined_call_operand.vmem [shape: f32[1,64], index: 10, kind: input, shape index: {}]   ;;  %s1207_s11 = inlined_call_operand.hbm [shape: f32[8,64], index: 11, kind: output, shape index: {}]  }
   0x1   :  { %17 = vsyncpa [#allocation6], 0 }
   0x2   :  { %18 = vsyncpa [#allocation4], 0  ;;  %s897_s17 = smov [#allocation5]  }
   0x3   :  { %s42_s18 = sshll.u32 %s897_s17, 4  ;;  %s43_s18 = int_to_ptr.vmem [resolvable:$true] %s42_s18 }
   0x4   :  { %s819_s19 = scalar_lea.vmem %s43_s18, 2048  ;;  %p824_p1 = scmp.lt.s32.totalorder %s43_s18, %s43_s18 }
   0x5   :  { %p820_p0 = scmp.ne.s32.totalorder %s43_s18, %s819_s19  ;;  %p825_p2 = scmp.lt.s32.totalorder %s819_s19, %s819_s19 }
   0x7   :  { %p826_p3 = por %p825_p2, %p824_p1 }
   0x9   :  { %p827_p4 = pnand %p826_p3, %p820_p0 }
   0xb   :  { %830 = shalt.err (!%p827_p4)
}
   0xc   :  { %s898_s20 = smov 128   ;;  %s899_s21 = smov 8  }
   0xd   :  { %48 = dma.hbm_to_vmem [thread:$0]  %s1201_s5, 2048, %s43_s18, [#allocation6], %s898_s20, %s898_s20, %s899_s21  }
   0xe   :  { %s900_s24 = smov [#allocation2]   ;;  %s901_s26 = smov [#allocation7]  }
   0xf   :  { %s25_s25 = sshll.u32 %s900_s24, 4  ;;  %s56_s27 = sshll.u32 %s901_s26, 4  ;;  %s26_s25 = int_to_ptr.vmem [resolvable:$true] %s25_s25  ;;  %s57_s27 = int_to_ptr.vmem [resolvable:$true] %s56_s27 }
  0x10   :  { %s839_s28 = scalar_lea.vmem %s26_s25, 128  ;;  %p844_p6 = scmp.lt.s32.totalorder %s26_s25, %s26_s25 }
  0x11   :  { %p840_p5 = scmp.ne.s32.totalorder %s26_s25, %s839_s28  ;;  %p845_p7 = scmp.lt.s32.totalorder %s839_s28, %s839_s28 }
  0x13   :  { %p846_p8 = por %p845_p7, %p844_p6 }
  0x15   :  { %p847_p9 = pnand %p846_p8, %p840_p5 }
  0x17   :  { %850 = shalt.err (!%p847_p9)
}
  0x18   :  { %28 = dma.hbm_to_vmem [thread:$0]  %s1196_s0, 128, %s26_s25, [#allocation3]  }
  0x19   :  { %s859_s12 = scalar_lea.vmem %s57_s27, 2048  ;;  %p864_p11 = scmp.lt.s32.totalorder %s57_s27, %s57_s27 }
  0x1a   :  { %p860_p10 = scmp.ne.s32.totalorder %s57_s27, %s859_s12  ;;  %p865_p12 = scmp.lt.s32.totalorder %s859_s12, %s859_s12 }
  0x1c   :  { %p866_p13 = por %p865_p12, %p864_p11 }
  0x1e   :  { %p867_p0 = pnand %p866_p13, %p860_p10 }
  0x20   :  { %870 = shalt.err (!%p867_p0)
}
  0x21   :  { %62 = dma.hbm_to_vmem [thread:$0]  %s1203_s7, 2048, %s57_s27, [#allocation6], %s898_s20, %s898_s20, %s899_s21  }
  0x22   :  { %891 = dma.done.wait [#allocation3], 128  }
  0x23   :  { %892 = vsyncadd [#allocation3], 4294967168 }
  0x24   :  { %893 = dma.done.wait [#allocation6], 4096  }
  0x25   :  { %894 = vsyncadd [#allocation6], 4294963200  ;;  %v902_v0 = vmov 0.0   ;;  %vm903_vm0 = vmmov 0   ;;  %v86_v1 = vld [vmem:[%s1197_s1 + $0x38] sm:$0xff]  ;;  %v85_v2 = vld [vmem:[%s1197_s1 + $0x30] sm:$0xff] }
  0x26   :  { %644 = vmatprep.subr.mxu0 %v902_v0  ;;  %660 = vmatprep.mubr.msk.f32.mxu0 %vm903_vm0, %v902_v0  ;;  %v84_v3 = vld [vmem:[%s1197_s1 + $0x28] sm:$0xff]  ;;  %v184_v4 = vld [vmem:[%s1199_s3 + $0x78] sm:$0xff]  ;;  %v183_v5 = vld [vmem:[%s1199_s3 + $0x70] sm:$0xff]  ;;  %vm94_vm1 = vcmask 523264   ;;  %s904_s26 = smov [#allocation8]  }
  0x27   :  { %663 = vmatprep.subr.mxu1 %v902_v0  ;;  %695 = vmatprep.mubr.msk.f32.mxu1 %vm903_vm0, %v902_v0  ;;  %v83_v6 = vld [vmem:[%s1197_s1 + $0x20] sm:$0xff]  ;;  %v182_v7 = vld [vmem:[%s1199_s3 + $0x68] sm:$0xff]  ;;  %v82_v8 = vld [vmem:[%s1197_s1 + $0x18] sm:$0xff]  ;;  %s551_s27 = sshll.u32 %s904_s26, 4  ;;  %s552_s27 = int_to_ptr.vmem [resolvable:$true] %s551_s27 }
  0x28   :  { %645 = vmatpush3.msra.mxu0 %v86_v1  ;;  %664 = vmatpush3.msra.mxu1 %v184_v4  ;;  %v181_v9 = vld [vmem:[%s1199_s3 + $0x60] sm:$0xff]  ;;  %v81_v10 = vld [vmem:[%s1197_s1 + $0x10] sm:$0xff]  ;;  %v180_v11 = vld [vmem:[%s1199_s3 + $0x58] sm:$0xff]  ;;  %p876_p2 = scmp.lt.s32.totalorder %s552_s27, %s552_s27 }
  0x29   :  { %646 = vmatprep.subr.mxu0 %v902_v0  ;;  %665 = vmatprep.subr.mxu1 %v902_v0  ;;  %v80_v12 = vld [vmem:[%s1197_s1 + $0x8] sm:$0xff]  ;;  %v179_v13 = vld [vmem:[%s1199_s3 + $0x50] sm:$0xff]  ;;  %v79_v14 = vld [vmem:[%s1197_s1] sm:$0xff] }
  0x2a   :  { %647 = vmatpush3.msra.mxu0 %v85_v2  ;;  %666 = vmatpush3.msra.mxu1 %v183_v5  ;;  %v78_v15 = vld [vmem:[#allocation2] sm:$0xff]  ;;  %v178_v16 = vld [vmem:[%s1199_s3 + $0x48] sm:$0xff]  ;;  %v176_v18 = vld [vmem:[%s1199_s3 + $0x38] sm:$0xff] }
  0x2b   :  { %648 = vmatprep.subr.mxu0 %v902_v0  ;;  %667 = vmatprep.subr.mxu1 %v902_v0  ;;  %v177_v17 = vld [vmem:[%s1199_s3 + $0x40] sm:$0xff]  ;;  %v175_v19 = vld [vmem:[%s1199_s3 + $0x30] sm:$0xff]  ;;  %v174_v20 = vld [vmem:[%s1199_s3 + $0x28] sm:$0xff] }
  0x2c   :  { %649 = vmatpush3.msra.mxu0 %v84_v3  ;;  %668 = vmatpush3.msra.mxu1 %v182_v7  ;;  %v173_v21 = vld [vmem:[%s1199_s3 + $0x20] sm:$0xff]  ;;  %v172_v22 = vld [vmem:[%s1199_s3 + $0x18] sm:$0xff]  ;;  %v171_v23 = vld [vmem:[%s1199_s3 + $0x10] sm:$0xff] }
  0x2d   :  { %650 = vmatprep.subr.mxu0 %v902_v0  ;;  %669 = vmatprep.subr.mxu1 %v902_v0  ;;  %v170_v24 = vld [vmem:[%s1199_s3 + $0x8] sm:$0xff]  ;;  %v169_v25 = vld [vmem:[%s1199_s3] sm:$0xff]  ;;  %v277_v27 = vld [vmem:[#allocation5 + $0x70] sm:$0xff] }
  0x2e   :  { %651 = vmatpush3.msra.mxu0 %v83_v6  ;;  %670 = vmatpush3.msra.mxu1 %v181_v9  ;;  %v278_v26 = vld [vmem:[#allocation5 + $0x78] sm:$0xff]  ;;  %v276_v28 = vld [vmem:[#allocation5 + $0x68] sm:$0xff]  ;;  %v275_v29 = vld [vmem:[#allocation5 + $0x60] sm:$0xff] }
  0x2f   :  { %652 = vmatprep.subr.mxu0 %v902_v0  ;;  %671 = vmatprep.subr.mxu1 %v902_v0  ;;  %v274_v30 = vld [vmem:[#allocation5 + $0x58] sm:$0xff]  ;;  %v273_v31 = vld [vmem:[#allocation5 + $0x50] sm:$0xff]  ;;  %v272_v32 = vld [vmem:[#allocation5 + $0x48] sm:$0xff] }
  0x30   :  { %653 = vmatpush3.msra.mxu0 %v82_v8  ;;  %672 = vmatpush3.msra.mxu1 %v180_v11  ;;  %v271_v33 = vld [vmem:[#allocation5 + $0x40] sm:$0xff]  ;;  %v270_v34 = vld [vmem:[#allocation5 + $0x38] sm:$0xff]  ;;  %v269_v35 = vld [vmem:[#allocation5 + $0x30] sm:$0xff] }
  0x31   :  { %654 = vmatprep.subr.mxu0 %v902_v0  ;;  %673 = vmatprep.subr.mxu1 %v902_v0  ;;  %v268_v36 = vld [vmem:[#allocation5 + $0x28] sm:$0xff]  ;;  %v267_v37 = vld [vmem:[#allocation5 + $0x20] sm:$0xff]  ;;  %v266_v38 = vld [vmem:[#allocation5 + $0x18] sm:$0xff] }
  0x32   :  { %655 = vmatpush3.msra.mxu0 %v81_v10  ;;  %674 = vmatpush3.msra.mxu1 %v179_v13  ;;  %v561_v39 = vld [vmem:[%s1198_s2] ss:$0 sm:$0xff]  ;;  %v265_v44 = vld [vmem:[#allocation5 + $0x10] sm:$0xff]  ;;  %v264_v45 = vld [vmem:[#allocation5 + $0x8] sm:$0xff] }
  0x33   :  { %656 = vmatprep.subr.mxu0 %v902_v0  ;;  %675 = vmatprep.subr.mxu1 %v902_v0  ;;  %v263_v46 = vld [vmem:[#allocation5] sm:$0xff]  ;;  %v372_v47 = vld [vmem:[#allocation7 + $0x78] sm:$0xff]  ;;  %v371_v48 = vld [vmem:[#allocation7 + $0x70] sm:$0xff] }
  0x34   :  { %657 = vmatpush3.msra.mxu0 %v80_v12  ;;  %676 = vmatpush3.msra.mxu1 %v178_v16  ;;  %v370_v49 = vld [vmem:[#allocation7 + $0x68] sm:$0xff]  ;;  %v369_v50 = vld [vmem:[#allocation7 + $0x60] sm:$0xff]  ;;  %v368_v51 = vld [vmem:[#allocation7 + $0x58] sm:$0xff] }
  0x35   :  { %658 = vmatprep.subr.mxu0 %v902_v0  ;;  %677 = vmatprep.subr.mxu1 %v902_v0  ;;  %v367_v52 = vld [vmem:[#allocation7 + $0x50] sm:$0xff]  ;;  %v366_v53 = vld [vmem:[#allocation7 + $0x48] sm:$0xff]  ;;  %v365_v54 = vld [vmem:[#allocation7 + $0x40] sm:$0xff] }
  0x36   :  { %659 = vmatpush3.msra.mxu0 %v79_v14  ;;  %678 = vmatpush3.msra.mxu1 %v177_v17  ;;  %v364_v55 = vld [vmem:[#allocation7 + $0x38] sm:$0xff]  ;;  %v363_v56 = vld [vmem:[#allocation7 + $0x30] sm:$0xff]  ;;  %v362_v57 = vld [vmem:[#allocation7 + $0x28] sm:$0xff] }
  0x37   :  { %661 = vmatmul.mubr.msk.f32.vlgmr.msra.gmra.mxu0 %vm94_vm1, %v78_v15  ;;  %698 = vmatprep.subr.mxu0 %v902_v0  ;;  %v361_v58 = vld [vmem:[#allocation7 + $0x20] sm:$0xff]  ;;  %v360_v59 = vld [vmem:[#allocation7 + $0x18] sm:$0xff]  ;;  %v359_v2 = vld [vmem:[#allocation7 + $0x10] sm:$0xff] }
  0x38   :  { %730 = vmatprep.mubr.msk.f32.mxu0 %vm903_vm0, %v902_v0  ;;  %679 = vmatprep.subr.mxu1 %v902_v0  ;;  %v563_v60 = vld [vmem:[%s1200_s4] ss:$0 sm:$0xff]  ;;  %v358_v3 = vld [vmem:[#allocation7 + $0x8] sm:$0xff]  ;;  %v357_v4 = vld [vmem:[#allocation7] sm:$0xff] }
  0x39   :  { %680 = vmatpush3.msra.mxu1 %v176_v18  ;;  %699 = vmatpush3.msra.mxu0 %v278_v26  ;;  %v466_v5 = vld [vmem:[%s1205_s9 + $0x78] sm:$0xff]  ;;  %v465_v6 = vld [vmem:[%s1205_s9 + $0x70] sm:$0xff]  ;;  %v464_v7 = vld [vmem:[%s1205_s9 + $0x68] sm:$0xff] }
  0x3a   :  { %681 = vmatprep.subr.mxu1 %v902_v0  ;;  %700 = vmatprep.subr.mxu0 %v902_v0  ;;  %v463_v8 = vld [vmem:[%s1205_s9 + $0x60] sm:$0xff]  ;;  %v462_v9 = vld [vmem:[%s1205_s9 + $0x58] sm:$0xff]  ;;  %v461_v10 = vld [vmem:[%s1205_s9 + $0x50] sm:$0xff] }
  0x3b   :  { %682 = vmatpush3.msra.mxu1 %v175_v19  ;;  %701 = vmatpush3.msra.mxu0 %v277_v27  ;;  %v460_v11 = vld [vmem:[%s1205_s9 + $0x48] sm:$0xff]  ;;  %v459_v12 = vld [vmem:[%s1205_s9 + $0x40] sm:$0xff]  ;;  %v458_v13 = vld [vmem:[%s1205_s9 + $0x38] sm:$0xff] }
  0x3c   :  { %683 = vmatprep.subr.mxu1 %v902_v0  ;;  %702 = vmatprep.subr.mxu0 %v902_v0  ;;  %v457_v14 = vld [vmem:[%s1205_s9 + $0x30] sm:$0xff]  ;;  %v456_v15 = vld [vmem:[%s1205_s9 + $0x28] sm:$0xff]  ;;  %v455_v16 = vld [vmem:[%s1205_s9 + $0x20] sm:$0xff] }
  0x3d   :  { %684 = vmatpush3.msra.mxu1 %v174_v20  ;;  %703 = vmatpush3.msra.mxu0 %v276_v28  ;;  %v454_v17 = vld [vmem:[%s1205_s9 + $0x18] sm:$0xff]  ;;  %v564_v18 = vld [vmem:[%s1202_s6] ss:$0 sm:$0xff] }
  0x3e   :  { %685 = vmatprep.subr.mxu1 %v902_v0  ;;  %704 = vmatprep.subr.mxu0 %v902_v0  ;;  %v565_v26 = vld [vmem:[%s1204_s8] ss:$0 sm:$0xff] }
  0x3f   :  { %686 = vmatpush3.msra.mxu1 %v173_v21  ;;  %705 = vmatpush3.msra.mxu0 %v275_v29 }
  0x40   :  { %687 = vmatprep.subr.mxu1 %v902_v0  ;;  %706 = vmatprep.subr.mxu0 %v902_v0 }
  0x41   :  { %688 = vmatpush3.msra.mxu1 %v172_v22  ;;  %707 = vmatpush3.msra.mxu0 %v274_v30 }
  0x42   :  { %689 = vmatprep.subr.mxu1 %v902_v0  ;;  %708 = vmatprep.subr.mxu0 %v902_v0 }
  0x43   :  { %690 = vmatpush3.msra.mxu1 %v171_v23  ;;  %709 = vmatpush3.msra.mxu0 %v273_v31  ;;  %v453_v23 = vld [vmem:[%s1205_s9 + $0x10] sm:$0xff]  ;;  %v566_v31 = vld [vmem:[%s1206_s10] ss:$0 sm:$0xff] }
  0x44   :  { %691 = vmatprep.subr.mxu1 %v902_v0  ;;  %710 = vmatprep.subr.mxu0 %v902_v0 }
  0x45   :  { %692 = vmatpush3.msra.mxu1 %v170_v24  ;;  %711 = vmatpush3.msra.mxu0 %v272_v32  ;;  %v452_v24 = vld [vmem:[%s1205_s9 + $0x8] sm:$0xff] }
  0x46   :  { %693 = vmatprep.subr.mxu1 %v902_v0  ;;  %712 = vmatprep.subr.mxu0 %v902_v0 }
  0x47   :  { %694 = vmatpush3.msra.mxu1 %v169_v25  ;;  %713 = vmatpush3.msra.mxu0 %v271_v33  ;;  %v451_v25 = vld [vmem:[%s1205_s9] sm:$0xff]  ;;  %s871_s9 = scalar_lea.vmem %s552_s27, 128 }
  0x48   :  { %733 = vmatprep.subr.mxu1 %v902_v0  ;;  %714 = vmatprep.subr.mxu0 %v902_v0  ;;  %p872_p1 = scmp.ne.s32.totalorder %s552_s27, %s871_s9  ;;  %p877_p3 = scmp.lt.s32.totalorder %s871_s9, %s871_s9 }
  0x49   :  { %715 = vmatpush3.msra.mxu0 %v270_v34 }
  0x4a   :  { %716 = vmatprep.subr.mxu0 %v902_v0  ;;  %p878_p4 = por %p877_p3, %p876_p2 }
  0x4b   :  { %717 = vmatpush3.msra.mxu0 %v269_v35 }
  0x4c   :  { %718 = vmatprep.subr.mxu0 %v902_v0  ;;  %p879_p5 = pnand %p878_p4, %p872_p1 }
  0x4d   :  { %719 = vmatpush3.msra.mxu0 %v268_v36 }
  0x4e   :  { %720 = vmatprep.subr.mxu0 %v902_v0 }
  0x4f   :  { %721 = vmatpush3.msra.mxu0 %v267_v37 }
  0x50   :  { %722 = vmatprep.subr.mxu0 %v902_v0 }
  0x51   :  { %723 = vmatpush3.msra.mxu0 %v266_v38 }
  0x52   :  { %724 = vmatprep.subr.mxu0 %v902_v0 }
  0x53   :  { %725 = vmatpush3.msra.mxu0 %v265_v44 }
  0x54   :  { %726 = vmatprep.subr.mxu0 %v902_v0 }
  0x55   :  { %727 = vmatpush3.msra.mxu0 %v264_v45 }
  0x56   :  { %728 = vmatprep.subr.mxu0 %v902_v0 }
  0x57   :  { %729 = vmatpush3.msra.mxu0 %v263_v46 }
  0x58   :  { %768 = vmatprep.subr.mxu0 %v902_v0 }
  0xf7   :  { %v164_v40 = vpop.f32.mrf.mxu0 }
  0xf8   :  { %v165_v41 = vadd.f32 %v561_v39, %v164_v40 }
  0xf9   :  { %v662_v42 = vpop.f32.mrf.mxu0 }
  0xfa   :  { %v168_v43 = vmax.f32 %v165_v41, 0.0 }
  0xfc   :  { %696 = vmatmul.mubr.f32.vlgmr.msra.gmra.mxu1 %v168_v43 }
  0xfd   :  { %765 = vmatprep.mubr.msk.f32.mxu1 %vm903_vm0, %v902_v0  ;;  %734 = vmatpush3.msra.mxu1 %v372_v47 }
  0xfe   :  { %735 = vmatprep.subr.mxu1 %v902_v0 }
  0xff   :  { %736 = vmatpush3.msra.mxu1 %v371_v48 }
 0x100   :  { %737 = vmatprep.subr.mxu1 %v902_v0 }
 0x101   :  { %738 = vmatpush3.msra.mxu1 %v370_v49 }
 0x102   :  { %739 = vmatprep.subr.mxu1 %v902_v0 }
 0x103   :  { %740 = vmatpush3.msra.mxu1 %v369_v50 }
 0x104   :  { %741 = vmatprep.subr.mxu1 %v902_v0 }
 0x105   :  { %742 = vmatpush3.msra.mxu1 %v368_v51 }
 0x106   :  { %743 = vmatprep.subr.mxu1 %v902_v0 }
 0x107   :  { %744 = vmatpush3.msra.mxu1 %v367_v52 }
 0x108   :  { %745 = vmatprep.subr.mxu1 %v902_v0 }
 0x109   :  { %746 = vmatpush3.msra.mxu1 %v366_v53 }
 0x10a   :  { %747 = vmatprep.subr.mxu1 %v902_v0 }
 0x10b   :  { %748 = vmatpush3.msra.mxu1 %v365_v54 }
 0x10c   :  { %749 = vmatprep.subr.mxu1 %v902_v0 }
 0x10d   :  { %750 = vmatpush3.msra.mxu1 %v364_v55 }
 0x10e   :  { %751 = vmatprep.subr.mxu1 %v902_v0 }
 0x10f   :  { %752 = vmatpush3.msra.mxu1 %v363_v56 }
 0x110   :  { %753 = vmatprep.subr.mxu1 %v902_v0 }
 0x111   :  { %754 = vmatpush3.msra.mxu1 %v362_v57 }
 0x112   :  { %755 = vmatprep.subr.mxu1 %v902_v0 }
 0x113   :  { %756 = vmatpush3.msra.mxu1 %v361_v58 }
 0x114   :  { %757 = vmatprep.subr.mxu1 %v902_v0 }
 0x115   :  { %758 = vmatpush3.msra.mxu1 %v360_v59 }
 0x116   :  { %759 = vmatprep.subr.mxu1 %v902_v0 }
 0x117   :  { %760 = vmatpush3.msra.mxu1 %v359_v2 }
 0x118   :  { %761 = vmatprep.subr.mxu1 %v902_v0 }
 0x119   :  { %762 = vmatpush3.msra.mxu1 %v358_v3 }
 0x11a   :  { %763 = vmatprep.subr.mxu1 %v902_v0 }
 0x11b   :  { %764 = vmatpush3.msra.mxu1 %v357_v4 }
 0x1bc   :  { %v258_v61 = vpop.f32.mrf.mxu1 }
 0x1bd   :  { %v259_v62 = vadd.f32 %v563_v60, %v258_v61 }
 0x1be   :  { %v697_v63 = vpop.f32.mrf.mxu1 }
 0x1bf   :  { %v262_v1 = vmax.f32 %v259_v62, 0.0 }
 0x1c1   :  { %731 = vmatmul.mubr.f32.vlgmr.msra.gmra.mxu0 %v262_v1 }
 0x1c2   :  { %800 = vmatprep.mubr.msk.f32.mxu0 %vm903_vm0, %v902_v0  ;;  %769 = vmatpush3.msra.mxu0 %v466_v5 }
 0x1c3   :  { %770 = vmatprep.subr.mxu0 %v902_v0 }
 0x1c4   :  { %771 = vmatpush3.msra.mxu0 %v465_v6 }
 0x1c5   :  { %772 = vmatprep.subr.mxu0 %v902_v0 }
 0x1c6   :  { %773 = vmatpush3.msra.mxu0 %v464_v7 }
 0x1c7   :  { %774 = vmatprep.subr.mxu0 %v902_v0 }
 0x1c8   :  { %775 = vmatpush3.msra.mxu0 %v463_v8 }
 0x1c9   :  { %776 = vmatprep.subr.mxu0 %v902_v0 }
 0x1ca   :  { %777 = vmatpush3.msra.mxu0 %v462_v9 }
 0x1cb   :  { %778 = vmatprep.subr.mxu0 %v902_v0 }
 0x1cc   :  { %779 = vmatpush3.msra.mxu0 %v461_v10 }
 0x1cd   :  { %780 = vmatprep.subr.mxu0 %v902_v0 }
 0x1ce   :  { %781 = vmatpush3.msra.mxu0 %v460_v11 }
 0x1cf   :  { %782 = vmatprep.subr.mxu0 %v902_v0 }
 0x1d0   :  { %783 = vmatpush3.msra.mxu0 %v459_v12 }
 0x1d1   :  { %784 = vmatprep.subr.mxu0 %v902_v0 }
 0x1d2   :  { %785 = vmatpush3.msra.mxu0 %v458_v13 }
 0x1d3   :  { %786 = vmatprep.subr.mxu0 %v902_v0 }
 0x1d4   :  { %787 = vmatpush3.msra.mxu0 %v457_v14 }
 0x1d5   :  { %788 = vmatprep.subr.mxu0 %v902_v0 }
 0x1d6   :  { %789 = vmatpush3.msra.mxu0 %v456_v15 }
 0x1d7   :  { %790 = vmatprep.subr.mxu0 %v902_v0 }
 0x1d8   :  { %791 = vmatpush3.msra.mxu0 %v455_v16 }
 0x1d9   :  { %792 = vmatprep.subr.mxu0 %v902_v0 }
 0x1da   :  { %793 = vmatpush3.msra.mxu0 %v454_v17 }
 0x1db   :  { %794 = vmatprep.subr.mxu0 %v902_v0 }
 0x1dc   :  { %795 = vmatpush3.msra.mxu0 %v453_v23 }
 0x1dd   :  { %796 = vmatprep.subr.mxu0 %v902_v0 }
 0x1de   :  { %797 = vmatpush3.msra.mxu0 %v452_v24 }
 0x1df   :  { %798 = vmatprep.subr.mxu0 %v902_v0 }
 0x1e0   :  { %799 = vmatpush3.msra.mxu0 %v451_v25 }
 0x281   :  { %v352_v19 = vpop.f32.mrf.mxu0 }
 0x282   :  { %v353_v20 = vadd.f32 %v564_v18, %v352_v19 }
 0x283   :  { %v732_v21 = vpop.f32.mrf.mxu0 }
 0x284   :  { %v356_v22 = vmax.f32 %v353_v20, 0.0 }
 0x286   :  { %766 = vmatmul.mubr.f32.vlgmr.msra.gmra.mxu1 %v356_v22 }
 0x346   :  { %v446_v27 = vpop.f32.mrf.mxu1 }
 0x347   :  { %v447_v28 = vadd.f32 %v565_v26, %v446_v27 }
 0x348   :  { %v767_v29 = vpop.f32.mrf.mxu1 }
 0x349   :  { %v450_v30 = vmax.f32 %v447_v28, 0.0 }
 0x34b   :  { %801 = vmatmul.mubr.f32.vlgmr.msra.gmra.mxu0 %v450_v30 }
 0x40b   :  { %v540_v0 = vpop.f32.mrf.mxu0 }
 0x40c   :  { %v541_v32 = vadd.f32 %v566_v31, %v540_v0 }
 0x40d   :  { %v802_v33 = vpop.f32.mrf.mxu0 }
 0x40e   :  { %544 = vst.msk [vmem:[#allocation8] sm:$0xff] %vm94_vm1, %v541_v32 }
 0x40f   :  { %882 = shalt.err (!%p879_p5)
}
 0x410   :  { %554 = dma.vmem_to_hbm [thread:$0]  %s552_s27, 128, %s1207_s11, [#allocation4]  }
 0x411   :  { %895 = dma.done.wait [#allocation4], 128  }
 0x412   :  { %896 = vsyncadd [#allocation4], 4294967168 }
 0x413   :  { %558 = vsyncpa [#allocation3], 1 }
 0x414   :  { %559 = vsyncpa [#allocation6], 1 }
 0x415   :  { %560 = vsyncpa [#allocation4], 1 }

</bundles_post_ra>
